<compile_context>
chip_gen: v7x
topology: tpu7x:2x2x1
jax: 0.10.0
libtpu: 0.0.40
codegen_flags: <defaults>
</compile_context>

<pallas_src>
import jax
import jax.numpy as jnp
from jax.experimental import pallas as pl
from jax.experimental.pallas import tpu as pltpu

_LANE = 128     # vreg lane width
_SUBLANE = 8    # f32 sublane count


def _round_up(x, m):
    return (x + m - 1) // m * m


def _sigmoid(x):
    # Identical formulation to the PyTorch module: 1 / (1 + exp(-x)).
    return 1.0 / (1.0 + jnp.exp(-x))


def mlp_kernel(x_ref, w1_ref, w2_ref, o_ref):
    # Two MXU matmuls with explicit f32 accumulation + fused sigmoids.
    z = jnp.dot(x_ref[...], w1_ref[...], preferred_element_type=jnp.float32)
    z2 = _sigmoid(z)
    z3 = jnp.dot(z2, w2_ref[...], preferred_element_type=jnp.float32)
    o_ref[...] = _sigmoid(z3).astype(o_ref.dtype)


def mlp_forward(x, w1, w2, *, block_m=128):
    B, I = x.shape
    I2, H = w1.shape
    H2, O = w2.shape
    assert I == I2 and H == H2

    # Lane/sublane-dense padded shapes.
    Ip = _round_up(I, _LANE)
    Hp = _round_up(H, _LANE)
    Op = _round_up(O, _LANE)
    tm = block_m if B >= block_m else _round_up(B, _SUBLANE)
    Bp = _round_up(B, tm)

    xp = jnp.pad(x.astype(jnp.float32), ((0, Bp - B), (0, Ip - I)))
    w1p = jnp.pad(w1.astype(jnp.float32), ((0, Ip - I), (0, Hp - H)))
    w2p = jnp.pad(w2.astype(jnp.float32), ((0, Hp - H), (0, Op - O)))

    # VMEM budget: double-buffered x/out tiles + resident weights (+1 MiB slack),
    # clamped so the scoped limit never exceeds v7x's 64 MiB physical VMEM.
    vmem_bytes = 4 * (2 * tm * (Ip + Op) + Ip * Hp + Hp * Op) + (1 << 20)
    vmem_limit = min(max(vmem_bytes, 16 << 20), 64 << 20)

    out_p = pl.pallas_call(
        mlp_kernel,
        out_shape=jax.ShapeDtypeStruct((Bp, Op), jnp.float32),
        grid_spec=pl.GridSpec(
            grid=(Bp // tm,),
            in_specs=[
                pl.BlockSpec((tm, Ip), lambda i: (i, 0)),   # x: tiled over batch
                pl.BlockSpec((Ip, Hp), lambda i: (0, 0)),   # w1: resident
                pl.BlockSpec((Hp, Op), lambda i: (0, 0)),   # w2: resident
            ],
            out_specs=pl.BlockSpec((tm, Op), lambda i: (i, 0)),
        ),
        compiler_params=pltpu.CompilerParams(
            dimension_semantics=("parallel",),
            vmem_limit_bytes=vmem_limit,
        ),
    )(xp, w1p, w2p)

    # Strip padding back to the caller's logical shape.
    return out_p[:B, :O]


if __name__ == "__main__":
    # Deterministic parameters / inputs (synthetic, no checkpoint load).
    input_num, hidden_num, output_num = 16, 32, 8
    batch = 8

    key = jax.random.PRNGKey(0)
    k_x, k_w1, k_w2 = jax.random.split(key, 3)

    x = jax.random.normal(k_x, (batch, input_num), dtype=jnp.float32)
    w1 = jax.random.normal(k_w1, (input_num, hidden_num), dtype=jnp.float32)
    w2 = jax.random.normal(k_w2, (hidden_num, output_num), dtype=jnp.float32)

    out = mlp_forward(x, w1, w2)
    jax.block_until_ready(out)

    # Pure-JAX reference with the same forward semantics.
    ref = 1.0 / (1.0 + jnp.exp(-((1.0 / (1.0 + jnp.exp(-(x @ w1)))) @ w2)))
    assert out.shape == (batch, output_num)
    assert jnp.allclose(out, ref, atol=1e-5, rtol=1e-5)

    print("KERNEL_OK")
</pallas_src>

<mosaic_0001>
module attributes {stable_mosaic.version = 11 : i64} {
  func.func @mlp_kernel(%arg0: i32, %arg1: memref<8x128xf32, #tpu.memory_space<vmem>>, %arg2: memref<128x128xf32, #tpu.memory_space<vmem>>, %arg3: memref<128x128xf32, #tpu.memory_space<vmem>>, %arg4: memref<8x128xf32, #tpu.memory_space<vmem>>) attributes {dimension_semantics = [#tpu.dimension_semantics<parallel>], iteration_bounds = array<i64: 1>, scalar_prefetch = 0 : i64, scratch_operands = 0 : i64, tpu.core_type = #tpu.core_type<tc>, window_params = [{transform_indices = @transform_0, window_bounds = array<i64: 8, 128>}, {pipeline_mode = #tpu.pipeline_mode<synchronous>, transform_indices = @transform_1, window_bounds = array<i64: 128, 128>}, {pipeline_mode = #tpu.pipeline_mode<synchronous>, transform_indices = @transform_2, window_bounds = array<i64: 128, 128>}, {transform_indices = @transform_3, window_bounds = array<i64: 8, 128>}]} {
    %c0 = arith.constant 0 : index
    %c0_0 = arith.constant 0 : index
    %0 = vector.load %arg1[%c0, %c0_0] : memref<8x128xf32, #tpu.memory_space<vmem>>, vector<8x128xf32>
    %c0_1 = arith.constant 0 : index
    %c0_2 = arith.constant 0 : index
    %1 = vector.load %arg2[%c0_1, %c0_2] : memref<128x128xf32, #tpu.memory_space<vmem>>, vector<128x128xf32>
    %cst = arith.constant dense<0.000000e+00> : vector<8x128xf32>
    %2 = tpu.matmul %0, %1, %cst {dimension_numbers = #tpu.dot_dimension_numbers<[1], [0], [0], [1], [0, 0, 1, 1], [], []>} : vector<8x128xf32>, vector<128x128xf32>, vector<8x128xf32> -> vector<8x128xf32>
    %cst_3 = arith.constant 0.000000e+00 : f32
    %3 = vector.broadcast %cst_3 : f32 to vector<8x128xf32>
    %4 = arith.subf %3, %2 : vector<8x128xf32>
    %5 = math.exp %4 : vector<8x128xf32>
    %cst_4 = arith.constant 1.000000e+00 : f32
    %6 = vector.broadcast %cst_4 : f32 to vector<8x128xf32>
    %7 = arith.addf %6, %5 : vector<8x128xf32>
    %cst_5 = arith.constant 1.000000e+00 : f32
    %8 = vector.broadcast %cst_5 : f32 to vector<8x128xf32>
    %9 = arith.divf %8, %7 : vector<8x128xf32>
    %c0_6 = arith.constant 0 : index
    %c0_7 = arith.constant 0 : index
    %10 = vector.load %arg3[%c0_6, %c0_7] : memref<128x128xf32, #tpu.memory_space<vmem>>, vector<128x128xf32>
    %cst_8 = arith.constant dense<0.000000e+00> : vector<8x128xf32>
    %11 = tpu.matmul %9, %10, %cst_8 {dimension_numbers = #tpu.dot_dimension_numbers<[1], [0], [0], [1], [0, 0, 1, 1], [], []>} : vector<8x128xf32>, vector<128x128xf32>, vector<8x128xf32> -> vector<8x128xf32>
    %cst_9 = arith.constant 0.000000e+00 : f32
    %12 = vector.broadcast %cst_9 : f32 to vector<8x128xf32>
    %13 = arith.subf %12, %11 : vector<8x128xf32>
    %14 = math.exp %13 : vector<8x128xf32>
    %cst_10 = arith.constant 1.000000e+00 : f32
    %15 = vector.broadcast %cst_10 : f32 to vector<8x128xf32>
    %16 = arith.addf %15, %14 : vector<8x128xf32>
    %cst_11 = arith.constant 1.000000e+00 : f32
    %17 = vector.broadcast %cst_11 : f32 to vector<8x128xf32>
    %18 = arith.divf %17, %16 : vector<8x128xf32>
    %c0_12 = arith.constant 0 : index
    %c0_13 = arith.constant 0 : index
    %19 = vector.load %arg4[%c0_12, %c0_13] : memref<8x128xf32, #tpu.memory_space<vmem>>, vector<8x128xf32>
    tpu.vector_store %arg4[%c0_12, %c0_13], %18 {strides = array<i32>} : memref<8x128xf32, #tpu.memory_space<vmem>>, vector<8x128xf32>,
    return
  }
  func.func @transform_0(%arg0: i32) -> (i32, i32) {
    %c0_i32 = arith.constant 0 : i32
    %c0_i32_0 = arith.constant 0 : i32
    return %arg0, %c0_i32 : i32, i32
  }
  func.func @transform_1(%arg0: i32) -> (i32, i32) {
    %c0_i32 = arith.constant 0 : i32
    %c0_i32_0 = arith.constant 0 : i32
    %c0_i32_1 = arith.constant 0 : i32
    return %c0_i32, %c0_i32_0 : i32, i32
  }
  func.func @transform_2(%arg0: i32) -> (i32, i32) {
    %c0_i32 = arith.constant 0 : i32
    %c0_i32_0 = arith.constant 0 : i32
    %c0_i32_1 = arith.constant 0 : i32
    return %c0_i32, %c0_i32_0 : i32, i32
  }
  func.func @transform_3(%arg0: i32) -> (i32, i32) {
    %c0_i32 = arith.constant 0 : i32
    %c0_i32_0 = arith.constant 0 : i32
    return %arg0, %c0_i32 : i32, i32
  }
}

</mosaic_0001>

<bundles_post_ra>
// kernel: tpu_custom_call.1
= control target key start
LH: loop header
LB: loop body
LE: loop exit
PB: predicated region body
PF: predicated region fallthrough
CT: control target
= control target key end

     0   :  { %8 = vsyncpa [#allocation3], 0  ;;  %s618_s0 = inlined_call_operand.hbm [shape: f32[8,128], index: 0, kind: input, shape index: {}]   ;;  %s619_s1 = inlined_call_operand.hbm [shape: f32[128,128], index: 1, kind: input, shape index: {}]   ;;  %s620_s2 = inlined_call_operand.hbm [shape: f32[128,128], index: 2, kind: input, shape index: {}]   ;;  %s621_s3 = inlined_call_operand.hbm [shape: f32[8,128], index: 3, kind: output, shape index: {}]  }
   0x1   :  { %9 = vsyncpa [#allocation6], 0 }
   0x2   :  { %10 = vsyncpa [#allocation4], 0  ;;  %s519_s12 = smov [#allocation5]   ;;  %s425_s16 = scalar_lea.hbm %s619_s1, 2048 }
   0x3   :  { %s26_s13 = sshll.u32 %s519_s12, 4  ;;  %p426_p0 = scmp.ne.s32.totalorder %s619_s1, %s425_s16  ;;  %s27_s13 = int_to_ptr.vmem [resolvable:$true] %s26_s13 }
   0x4   :  { %p429_p1 = scmp.lt.u32.totalorder %s425_s16, %s619_s1 }
   0x6   :  { %p431_p2 = pnand %p429_p1, %p426_p0 }
   0x8   :  { %434 = shalt.err (!%p431_p2)
}
   0x9   :  { %s435_s21 = scalar_lea.vmem %s27_s13, 2048  ;;  %p440_p4 = scmp.lt.s32.totalorder %s27_s13, %s27_s13 }
   0xa   :  { %p436_p3 = scmp.ne.s32.totalorder %s27_s13, %s435_s21  ;;  %p441_p5 = scmp.lt.s32.totalorder %s435_s21, %s435_s21 }
   0xc   :  { %p442_p6 = por %p441_p5, %p440_p4 }
   0xe   :  { %p443_p7 = pnand %p442_p6, %p436_p3 }
  0x10   :  { %446 = shalt.err (!%p443_p7)
}
  0x11   :  { %s520_s22 = smov 128   ;;  %s521_s23 = smov 8  }
  0x12   :  { %32 = dma.hbm_to_vmem [thread:$0]  %s619_s1, 2048, %s27_s13, [#allocation6], %s520_s22, %s520_s22, %s521_s23  }
  0x13   :  { %s522_s26 = smov [#allocation2]   ;;  %s523_s28 = smov [#allocation7]  }
  0x14   :  { %s17_s27 = sshll.u32 %s522_s26, 4  ;;  %s38_s29 = sshll.u32 %s523_s28, 4  ;;  %s18_s27 = int_to_ptr.vmem [resolvable:$true] %s17_s27  ;;  %s39_s29 = int_to_ptr.vmem [resolvable:$true] %s38_s29 }
  0x15   :  { %s447_s5 = scalar_lea.hbm %s618_s0, 128 }
  0x16   :  { %p448_p8 = scmp.ne.s32.totalorder %s618_s0, %s447_s5  ;;  %p451_p9 = scmp.lt.u32.totalorder %s447_s5, %s618_s0 }
  0x18   :  { %p453_p10 = pnand %p451_p9, %p448_p8 }
  0x1a   :  { %456 = shalt.err (!%p453_p10)
}
  0x1b   :  { %s457_s1 = scalar_lea.vmem %s18_s27, 128  ;;  %p462_p12 = scmp.lt.s32.totalorder %s18_s27, %s18_s27 }
  0x1c   :  { %p458_p11 = scmp.ne.s32.totalorder %s18_s27, %s457_s1  ;;  %p463_p13 = scmp.lt.s32.totalorder %s457_s1, %s457_s1 }
  0x1e   :  { %p464_p0 = por %p463_p13, %p462_p12 }
  0x20   :  { %p465_p1 = pnand %p464_p0, %p458_p11 }
  0x22   :  { %468 = shalt.err (!%p465_p1)
}
  0x23   :  { %20 = dma.hbm_to_vmem [thread:$0]  %s618_s0, 128, %s18_s27, [#allocation3]  }
  0x24   :  { %s469_s14 = scalar_lea.hbm %s620_s2, 2048 }
  0x25   :  { %p470_p2 = scmp.ne.s32.totalorder %s620_s2, %s469_s14  ;;  %p473_p3 = scmp.lt.u32.totalorder %s469_s14, %s620_s2 }
  0x27   :  { %p475_p4 = pnand %p473_p3, %p470_p2 }
  0x29   :  { %478 = shalt.err (!%p475_p4)
}
  0x2a   :  { %s479_s19 = scalar_lea.vmem %s39_s29, 2048  ;;  %p484_p6 = scmp.lt.s32.totalorder %s39_s29, %s39_s29 }
  0x2b   :  { %p480_p5 = scmp.ne.s32.totalorder %s39_s29, %s479_s19  ;;  %p485_p7 = scmp.lt.s32.totalorder %s479_s19, %s479_s19 }
  0x2d   :  { %p486_p8 = por %p485_p7, %p484_p6 }
  0x2f   :  { %p487_p9 = pnand %p486_p8, %p480_p5 }
  0x31   :  { %490 = shalt.err (!%p487_p9)
}
  0x32   :  { %44 = dma.hbm_to_vmem [thread:$0]  %s620_s2, 2048, %s39_s29, [#allocation6], %s520_s22, %s520_s22, %s521_s23  }
  0x33   :  { %513 = dma.done.wait [#allocation3], 128  }
  0x34   :  { %514 = vsyncadd [#allocation3], 4294967168 }
  0x35   :  { %515 = dma.done.wait [#allocation6], 4096  }
  0x36   :  { %516 = vsyncadd [#allocation6], 4294963200  ;;  %v524_v0 = vmov 0.0|0.0   ;;  %vm525_vm0 = vmmov 0   ;;  %v526_v1 = vmov 0.0   ;;  %v55_v2 = vld [vmem:[#allocation5] sm:$0xff] }
  0x37   :  { %360 = vmatprep.subr.bf16.mxu0 %v524_v0  ;;  %322 = vmatprep.mubr.msk.f32.mxu0 %vm525_vm0, %v526_v1  ;;  %v56_v3 = vld [vmem:[#allocation5 + $0x8] sm:$0xff]  ;;  %v57_v4 = vld [vmem:[#allocation5 + $0x10] sm:$0xff]  ;;  %v58_v6 = vld [vmem:[#allocation5 + $0x18] sm:$0xff]  ;;  %s527_s2 = smov [#allocation8]  }
  0x38   :  { %384 = vmatprep.subr.bf16.mxu1 %v524_v0  ;;  %357 = vmatprep.mubr.msk.f32.mxu1 %vm525_vm0, %v526_v1  ;;  %v361_v5 = vpack.c.bf16 %v56_v3, %v55_v2  ;;  %v364_v7 = vpack.c.bf16 %v58_v6, %v57_v4  ;;  %v59_v8 = vld [vmem:[#allocation5 + $0x20] sm:$0xff]  ;;  %v60_v9 = vld [vmem:[#allocation5 + $0x28] sm:$0xff]  ;;  %v61_v14 = vld [vmem:[#allocation5 + $0x30] sm:$0xff]  ;;  %s246_s21 = sshll.u32 %s527_s2, 4  ;;  %s247_s21 = int_to_ptr.vmem [resolvable:$true] %s246_s21 }
  0x39   :  { %v147_v10 = vld [vmem:[#allocation7] sm:$0xff]  ;;  %v148_v11 = vld [vmem:[#allocation7 + $0x8] sm:$0xff]  ;;  %v367_v12 = vpack.c.bf16 %v60_v9, %v59_v8  ;;  %v62_v15 = vld [vmem:[#allocation5 + $0x38] sm:$0xff]  ;;  %s491_s22 = scalar_lea.vmem %s247_s21, 128  ;;  %p496_p11 = scmp.lt.s32.totalorder %s247_s21, %s247_s21 }
  0x3a   :  { %362 = vmatpush3.bf16.msra.mxu0 %v361_v5  ;;  %v385_v13 = vpack.c.bf16 %v148_v11, %v147_v10  ;;  %v370_v16 = vpack.c.bf16 %v62_v15, %v61_v14  ;;  %v63_v17 = vld [vmem:[#allocation5 + $0x40] sm:$0xff]  ;;  %v64_v18 = vld [vmem:[#allocation5 + $0x48] sm:$0xff]  ;;  %v65_v20 = vld [vmem:[#allocation5 + $0x50] sm:$0xff]  ;;  %p492_p10 = scmp.ne.s32.totalorder %s247_s21, %s491_s22  ;;  %p497_p12 = scmp.lt.s32.totalorder %s491_s22, %s491_s22 }
  0x3b   :  { %363 = vmatprep.subr.bf16.mxu0 %v524_v0  ;;  %v373_v19 = vpack.c.bf16 %v64_v18, %v63_v17  ;;  %v66_v21 = vld [vmem:[#allocation5 + $0x58] sm:$0xff]  ;;  %v67_v23 = vld [vmem:[#allocation5 + $0x60] sm:$0xff]  ;;  %v68_v24 = vld [vmem:[#allocation5 + $0x68] sm:$0xff] }
  0x3c   :  { %386 = vmatpush3.bf16.msra.mxu1 %v385_v13  ;;  %v376_v22 = vpack.c.bf16 %v66_v21, %v65_v20  ;;  %v379_v25 = vpack.c.bf16 %v68_v24, %v67_v23  ;;  %v69_v26 = vld [vmem:[#allocation5 + $0x70] sm:$0xff]  ;;  %v70_v27 = vld [vmem:[#allocation5 + $0x78] sm:$0xff]  ;;  %v151_v33 = vld [vmem:[#allocation7 + $0x20] sm:$0xff]  ;;  %p498_p13 = por %p497_p12, %p496_p11 }
  0x3d   :  { %387 = vmatprep.subr.bf16.mxu1 %v524_v0  ;;  %v382_v28 = vpack.c.bf16 %v70_v27, %v69_v26  ;;  %v54_v29 = vld [vmem:[#allocation2] sm:$0xff]  ;;  %v149_v30 = vld [vmem:[#allocation7 + $0x10] sm:$0xff]  ;;  %v152_v34 = vld [vmem:[#allocation7 + $0x28] sm:$0xff] }
  0x3e   :  { %365 = vmatpush3.bf16.msra.mxu0 %v364_v7  ;;  %v150_v31 = vld [vmem:[#allocation7 + $0x18] sm:$0xff]  ;;  %v391_v35 = vpack.c.bf16 %v152_v34, %v151_v33  ;;  %v153_v36 = vld [vmem:[#allocation7 + $0x30] sm:$0xff]  ;;  %v155_v39 = vld [vmem:[#allocation7 + $0x40] sm:$0xff]  ;;  %p499_p0 = pnand %p498_p13, %p492_p10 }
  0x3f   :  { %366 = vmatprep.subr.bf16.mxu0 %v524_v0  ;;  %v388_v32 = vpack.c.bf16 %v150_v31, %v149_v30  ;;  %v154_v37 = vld [vmem:[#allocation7 + $0x38] sm:$0xff]  ;;  %v156_v40 = vld [vmem:[#allocation7 + $0x48] sm:$0xff]  ;;  %v157_v42 = vld [vmem:[#allocation7 + $0x50] sm:$0xff] }
  0x40   :  { %v394_v38 = vpack.c.bf16 %v154_v37, %v153_v36  ;;  %v397_v41 = vpack.c.bf16 %v156_v40, %v155_v39  ;;  %v158_v43 = vld [vmem:[#allocation7 + $0x58] sm:$0xff]  ;;  %v159_v45 = vld [vmem:[#allocation7 + $0x60] sm:$0xff]  ;;  %v160_v46 = vld [vmem:[#allocation7 + $0x68] sm:$0xff] }
  0x41   :  { %389 = vmatpush3.bf16.msra.mxu1 %v388_v32  ;;  %v400_v44 = vpack.c.bf16 %v158_v43, %v157_v42  ;;  %v403_v47 = vpack.c.bf16 %v160_v46, %v159_v45  ;;  %v161_v48 = vld [vmem:[#allocation7 + $0x70] sm:$0xff]  ;;  %v162_v49 = vld [vmem:[#allocation7 + $0x78] sm:$0xff] }
  0x42   :  { %368 = vmatpush3.bf16.msra.mxu0 %v367_v12  ;;  %390 = vmatprep.subr.bf16.mxu1 %v524_v0  ;;  %v406_v50 = vpack.c.bf16 %v162_v49, %v161_v48 }
  0x43   :  { %369 = vmatprep.subr.bf16.mxu0 %v524_v0 }
  0x45   :  { %392 = vmatpush3.bf16.msra.mxu1 %v391_v35 }
  0x46   :  { %371 = vmatpush3.bf16.msra.mxu0 %v370_v16  ;;  %393 = vmatprep.subr.bf16.mxu1 %v524_v0 }
  0x47   :  { %372 = vmatprep.subr.bf16.mxu0 %v524_v0 }
  0x49   :  { %395 = vmatpush3.bf16.msra.mxu1 %v394_v38 }
  0x4a   :  { %374 = vmatpush3.bf16.msra.mxu0 %v373_v19  ;;  %396 = vmatprep.subr.bf16.mxu1 %v524_v0 }
  0x4b   :  { %375 = vmatprep.subr.bf16.mxu0 %v524_v0 }
  0x4d   :  { %398 = vmatpush3.bf16.msra.mxu1 %v397_v41 }
  0x4e   :  { %377 = vmatpush3.bf16.msra.mxu0 %v376_v22  ;;  %399 = vmatprep.subr.bf16.mxu1 %v524_v0 }
  0x4f   :  { %378 = vmatprep.subr.bf16.mxu0 %v524_v0 }
  0x51   :  { %401 = vmatpush3.bf16.msra.mxu1 %v400_v44 }
  0x52   :  { %380 = vmatpush3.bf16.msra.mxu0 %v379_v25  ;;  %402 = vmatprep.subr.bf16.mxu1 %v524_v0 }
  0x53   :  { %381 = vmatprep.subr.bf16.mxu0 %v524_v0 }
  0x55   :  { %404 = vmatpush3.bf16.msra.mxu1 %v403_v47 }
  0x56   :  { %383 = vmatpush3.bf16.msra.mxu0 %v382_v28  ;;  %405 = vmatprep.subr.bf16.mxu1 %v524_v0 }
  0x59   :  { %323 = vmatmul.mubr.f32.vlgmr.msra.gmra.mrb[0].mxu0 %v54_v29  ;;  %407 = vmatpush3.bf16.msra.mxu1 %v406_v50 }
 0x12c   :  { %v137_v51 = vpop.f32.mrb[0].mxu0 }
 0x12d   :  { %v141_v52 = vsub.f32 0.0, %v137_v51  ;;  %v324_v53 = vpop.f32.mrb[1].mxu0 }
 0x12f   :  { %v142_v54 = vmul.f32 1.442695, %v141_v52 }
 0x131   :  { %417 = vpow2.f32 %v142_v54 }
 0x13b   :  { %v418_v55 = vpop.eup %417 }
 0x13c   :  { %v144_v56 = vadd.f32 1.0, %v418_v55 }
 0x13e   :  { %419 = vrcp.f32 %v144_v56 }
 0x148   :  { %v420_v57 = vpop.eup %419 }
 0x149   :  { %358 = vmatmul.mubr.f32.vlgmr.msra.gmra.mrb[0].mxu1 %v420_v57 }
 0x21c   :  { %v229_v58 = vpop.f32.mrb[0].mxu1 }
 0x21d   :  { %v233_v59 = vsub.f32 0.0, %v229_v58  ;;  %v359_v60 = vpop.f32.mrb[1].mxu1 }
 0x21f   :  { %v234_v61 = vmul.f32 1.442695, %v233_v59 }
 0x221   :  { %421 = vpow2.f32 %v234_v61 }
 0x22b   :  { %v422_v62 = vpop.eup %421 }
 0x22c   :  { %v236_v63 = vadd.f32 1.0, %v422_v62 }
 0x22e   :  { %423 = vrcp.f32 %v236_v63 }
 0x238   :  { %v424_v0 = vpop.eup %423 }
 0x239   :  { %239 = vst [vmem:[#allocation8] sm:$0xff] %v424_v0 }
 0x23a   :  { %502 = shalt.err (!%p499_p0)
}
 0x23b   :  { %s503_s25 = scalar_lea.hbm %s621_s3, 128 }
 0x23c   :  { %p504_p1 = scmp.ne.s32.totalorder %s621_s3, %s503_s25  ;;  %p507_p2 = scmp.lt.u32.totalorder %s503_s25, %s621_s3 }
 0x23e   :  { %p509_p3 = pnand %p507_p2, %p504_p1 }
 0x240   :  { %512 = shalt.err (!%p509_p3)
}
 0x241   :  { %249 = dma.vmem_to_hbm [thread:$0]  %s247_s21, 128, %s621_s3, [#allocation4]  }
 0x242   :  { %517 = dma.done.wait [#allocation4], 128  }
 0x243   :  { %518 = vsyncadd [#allocation4], 4294967168 }
 0x244   :  { %253 = vsyncpa [#allocation3], 1 }
 0x245   :  { %254 = vsyncpa [#allocation6], 1 }
 0x246   :  { %255 = vsyncpa [#allocation4], 1 }

</bundles_post_ra>
